<compile_context>
chip_gen: v5e
topology: v5e:2x2
jax: 0.10.0
libtpu: 0.0.40
codegen_flags: <defaults>
</compile_context>

<pallas_src>
import jax
import jax.numpy as jnp
from jax.experimental import pallas as pl
from jax.experimental.pallas import tpu as pltpu


_TARGET_BLOCK_BYTES = 2 << 20    # ~2 MiB x-block; ~8 MiB live w/ double-buffered in+out
_BASE_MAX_TILE_C = 4096          # baseline lane-axis cap (multiple of 128)
_SMALL_TENSOR_BYTES = 2 << 20    # below this, the fused XLA affine fast path wins
_SPLIT_MIN_BYTES = 512 << 10     # only force a 2-way (megacore) split above this


def _bn_kernel(x_ref, scale_ref, shift_ref, o_ref):
    # x_ref: (tile_r, tile_c); scale_ref/shift_ref: (tile_r, 1) -> lane broadcast.
    x = x_ref[...].astype(jnp.float32)
    o_ref[...] = (x * scale_ref[...] + shift_ref[...]).astype(o_ref.dtype)


def _round_up(x, m):
    return ((x + m - 1) // m) * m


def _sublane_multiple(dtype):
    # Packed sublane multiple: f32 -> 8, bf16/f16 -> 16, int8/fp8 -> 32.
    itemsize = jnp.dtype(dtype).itemsize
    return max(8, 8 * (4 // max(1, itemsize)))


def _pick_lane_tile(cols, lane_cap):
    """Lane (last-axis) tile: full extent if it fits, else a 128-aligned value
    that splits cols evenly (or near-evenly) to avoid a narrow masked tail."""
    if cols <= lane_cap:
        return cols
    cap128 = (lane_cap // 128) * 128
    # Prefer a 128-aligned divisor of cols within 2x of the cap -> no tail block.
    lo = max(128, (cap128 // 2 // 128) * 128)
    tc = cap128
    while tc >= lo:
        if cols % tc == 0:
            return tc
        tc -= 128
    # Fall back to a near-even 128-aligned split (small masked tail only).
    nblocks = -(-cols // cap128)
    return min(cap128, _round_up(-(-cols // nblocks), 128))


def _choose_tiles(rows, cols, dtype):
    """Pick (tile_r, tile_c, sublane_multiple) honoring the (8,128) constraint."""
    itemsize = jnp.dtype(dtype).itemsize
    sub = _sublane_multiple(dtype)
    target_elems = max(1, _TARGET_BLOCK_BYTES // itemsize)

    # Row (sublane) capacity: full extent if small, else largest dtype-aligned fit.
    r_cap = rows if rows <= sub else (rows // sub) * sub

    # Lane cap widens for small-row shapes so blocks still reach ~2 MiB.
    lane_cap = max(_BASE_MAX_TILE_C, _round_up(target_elems // max(1, r_cap), 128))
    tile_c = _pick_lane_tile(cols, lane_cap)

    if rows <= sub:
        tile_r = rows
    else:
        t = max(1, target_elems // max(1, tile_c))
        t = max(sub, (t // sub) * sub)
        tile_r = min(t, r_cap)
    return tile_r, tile_c, sub


def _maybe_split_for_megacore(rows, cols, tile_r, tile_c, sub, itemsize):
    """Guarantee >= 2 grid blocks for medium+ tensors so v7x's second
    TensorCore has work (neutral on single-TC v5e/v6e)."""
    n_blocks = (-(-rows // tile_r)) * (-(-cols // tile_c))
    if n_blocks >= 2 or rows * cols * itemsize < _SPLIT_MIN_BYTES:
        return tile_r, tile_c
    if rows >= 2 * sub:
        # Split the sublane axis (keeps full-width lane stores).
        tile_r = max(sub, _round_up(-(-rows // 2), sub))
    elif cols >= 256:
        # Split the lane axis on a 128-aligned boundary.
        tile_c = min(tile_c, _round_up(-(-cols // 2), 128))
    return tile_r, tile_c


def bn_layer_forward(x_nchw, weight, bias, running_mean, running_var, eps=1e-5,
                     force_pallas=False):
    """Inference batch norm matching torch.nn.functional.batch_norm(training=False)."""
    N, C, H, W = x_nchw.shape
    rows, cols = N * C, H * W

    # Fold mean/var/weight/bias into per-channel scale & shift (f32, matching
    # torch's internal promotion); tiny, plain-JAX glue.
    inv_std = 1.0 / jnp.sqrt(running_var.astype(jnp.float32) + eps)
    scale_c = weight.astype(jnp.float32) * inv_std                        # (C,)
    shift_c = bias.astype(jnp.float32) - running_mean.astype(jnp.float32) * scale_c

    total_bytes = x_nchw.size * x_nchw.dtype.itemsize
    if total_bytes < _SMALL_TENSOR_BYTES and not force_pallas:
        # Tiny tensors: fused XLA affine beats any kernel-launch overhead.
        y = (x_nchw.astype(jnp.float32) * scale_c.reshape(1, C, 1, 1)
             + shift_c.reshape(1, C, 1, 1))
        return y.astype(x_nchw.dtype)

    # TODO(synk): the order-of-magnitude win is fusing this affine into the
    # producing conv/matmul epilogue (deletes one full HBM read+write of the
    # activations); this standalone kernel is the fallback path.

    scale = jnp.tile(scale_c, N).reshape(rows, 1)                         # (N*C, 1)
    shift = jnp.tile(shift_c, N).reshape(rows, 1)                         # (N*C, 1)

    # Zero-copy layout change: channel axis folded into rows, spatial on lanes.
    x2d = x_nchw.reshape(rows, cols)
    itemsize = x2d.dtype.itemsize

    tile_r, tile_c, sub = _choose_tiles(rows, cols, x2d.dtype)
    tile_r, tile_c = _maybe_split_for_megacore(rows, cols, tile_r, tile_c, sub, itemsize)
    grid = (pl.cdiv(rows, tile_r), pl.cdiv(cols, tile_c))

    out2d = pl.pallas_call(
        _bn_kernel,
        out_shape=jax.ShapeDtypeStruct((rows, cols), x_nchw.dtype),
        grid=grid,
        in_specs=[
            pl.BlockSpec((tile_r, tile_c), lambda i, j: (i, j)),
            pl.BlockSpec((tile_r, 1), lambda i, j: (i, 0)),
            pl.BlockSpec((tile_r, 1), lambda i, j: (i, 0)),
        ],
        out_specs=pl.BlockSpec((tile_r, tile_c), lambda i, j: (i, j)),
        compiler_params=pltpu.CompilerParams(
            dimension_semantics=("parallel", "parallel"),
            vmem_limit_bytes=32 << 20,   # explicit; ~8 MiB live fits every generation
        ),
    )(x2d, scale, shift)

    # Zero-copy back to NCHW.
    return out2d.reshape(N, C, H, W)


def _reference(x, weight, bias, running_mean, running_var, eps=1e-5):
    C = x.shape[1]
    return ((x - running_mean.reshape(1, C, 1, 1))
            / jnp.sqrt(running_var.reshape(1, C, 1, 1) + eps)
            * weight.reshape(1, C, 1, 1) + bias.reshape(1, C, 1, 1))


if __name__ == "__main__":
    key = jax.random.PRNGKey(0)
    k_x, k_w, k_b, k_x2 = jax.random.split(key, 4)

    # Small shape consistent with the module (feature_size = C = 4).
    N, C, H, W = 2, 4, 16, 16
    x = jax.random.normal(k_x, (N, C, H, W), dtype=jnp.float32)
    # Deterministic parameter init mirroring create_Param: Normal(mean=0, std=1).
    weight = jax.random.normal(k_w, (C,), dtype=jnp.float32)
    bias = jax.random.normal(k_b, (C,), dtype=jnp.float32)
    running_mean = jnp.zeros((C,), dtype=jnp.float32)
    running_var = jnp.ones((C,), dtype=jnp.float32)

    # Exercise the Pallas kernel (force past the small-tensor fast path).
    out = bn_layer_forward(x, weight, bias, running_mean, running_var,
                           force_pallas=True)
    out = jax.block_until_ready(out)
    ref = _reference(x, weight, bias, running_mean, running_var)
    assert jnp.allclose(out, ref, atol=1e-5, rtol=1e-5), "mismatch vs reference (small)"

    # Also check the fast path agrees.
    out_fast = jax.block_until_ready(
        bn_layer_forward(x, weight, bias, running_mean, running_var))
    assert jnp.allclose(out_fast, ref, atol=1e-5, rtol=1e-5), "fast path mismatch"

    # Medium shape: exercises the forced 2-way megacore split / tiling path.
    N2, C2, H2, W2 = 2, 4, 64, 128
    x2 = jax.random.normal(k_x2, (N2, C2, H2, W2), dtype=jnp.float32)
    out2 = jax.block_until_ready(
        bn_layer_forward(x2, weight, bias, running_mean, running_var,
                         force_pallas=True))
    ref2 = _reference(x2, weight, bias, running_mean, running_var)
    assert jnp.allclose(out2, ref2, atol=1e-5, rtol=1e-5), "mismatch vs reference (medium)"

    print("KERNEL_OK")
</pallas_src>

<mosaic_0001>
module attributes {stable_mosaic.version = 11 : i64} {
  func.func @_bn_kernel(%arg0: i32, %arg1: i32, %arg2: memref<8x256xf32, #tpu.memory_space<vmem>>, %arg3: memref<8x1xf32, #tpu.memory_space<vmem>>, %arg4: memref<8x1xf32, #tpu.memory_space<vmem>>, %arg5: memref<8x256xf32, #tpu.memory_space<vmem>>) attributes {dimension_semantics = [#tpu.dimension_semantics<parallel>, #tpu.dimension_semantics<parallel>], iteration_bounds = array<i64: 1, 1>, scalar_prefetch = 0 : i64, scratch_operands = 0 : i64, tpu.core_type = #tpu.core_type<tc>, window_params = [{transform_indices = @transform_0, window_bounds = array<i64: 8, 256>}, {transform_indices = @transform_1, window_bounds = array<i64: 8, 1>}, {transform_indices = @transform_2, window_bounds = array<i64: 8, 1>}, {transform_indices = @transform_3, window_bounds = array<i64: 8, 256>}]} {
    %c0 = arith.constant 0 : index
    %c0_0 = arith.constant 0 : index
    %0 = vector.load %arg2[%c0, %c0_0] : memref<8x256xf32, #tpu.memory_space<vmem>>, vector<8x256xf32>
    %c0_1 = arith.constant 0 : index
    %c0_2 = arith.constant 0 : index
    %1 = vector.load %arg3[%c0_1, %c0_2] : memref<8x1xf32, #tpu.memory_space<vmem>>, vector<8x1xf32>
    %2 = vector.broadcast %1 : vector<8x1xf32> to vector<8x256xf32>
    %3 = arith.mulf %0, %2 : vector<8x256xf32>
    %c0_3 = arith.constant 0 : index
    %c0_4 = arith.constant 0 : index
    %4 = vector.load %arg4[%c0_3, %c0_4] : memref<8x1xf32, #tpu.memory_space<vmem>>, vector<8x1xf32>
    %5 = vector.broadcast %4 : vector<8x1xf32> to vector<8x256xf32>
    %6 = arith.addf %3, %5 : vector<8x256xf32>
    %c0_5 = arith.constant 0 : index
    %c0_6 = arith.constant 0 : index
    %7 = vector.load %arg5[%c0_5, %c0_6] : memref<8x256xf32, #tpu.memory_space<vmem>>, vector<8x256xf32>
    tpu.vector_store %arg5[%c0_5, %c0_6], %6 {strides = array<i32>} : memref<8x256xf32, #tpu.memory_space<vmem>>, vector<8x256xf32>,
    return
  }
  func.func @transform_0(%arg0: i32, %arg1: i32) -> (i32, i32) {
    %c0_i32 = arith.constant 0 : i32
    return %arg0, %arg1 : i32, i32
  }
  func.func @transform_1(%arg0: i32, %arg1: i32) -> (i32, i32) {
    %c0_i32 = arith.constant 0 : i32
    %c0_i32_0 = arith.constant 0 : i32
    return %arg0, %c0_i32 : i32, i32
  }
  func.func @transform_2(%arg0: i32, %arg1: i32) -> (i32, i32) {
    %c0_i32 = arith.constant 0 : i32
    %c0_i32_0 = arith.constant 0 : i32
    return %arg0, %c0_i32 : i32, i32
  }
  func.func @transform_3(%arg0: i32, %arg1: i32) -> (i32, i32) {
    %c0_i32 = arith.constant 0 : i32
    return %arg0, %arg1 : i32, i32
  }
}

</mosaic_0001>

<bundles_post_ra>
// kernel: tpu_custom_call.1
= control target key start
LH: loop header
LB: loop body
LE: loop exit
PB: predicated region body
PF: predicated region fallthrough
CT: control target
= control target key end

     0   :  { %s117_s0 = inlined_call_operand.vmem [shape: f32[8,256], index: 0, kind: input, shape index: {}]   ;;  %s118_s1 = inlined_call_operand.vmem [shape: f32[8,1], index: 1, kind: input, shape index: {}]   ;;  %s119_s2 = inlined_call_operand.vmem [shape: f32[8,1], index: 2, kind: input, shape index: {}]   ;;  %s120_s3 = inlined_call_operand.hbm [shape: f32[8,256], index: 3, kind: output, shape index: {}]  }
   0x1   :  { %v17_v0 = vld [vmem:[%s118_s1] sm:$0xff] }
   0x2   :  { %8 = vsyncpa [#allocation3], 0  ;;  %v80_v1 = vmov 0   ;;  %v25_v2 = vld [vmem:[%s119_s2] sm:$0xff]  ;;  %v16_v5 = vld [vmem:[%s117_s0 + $0x8] sm:$0xff]  ;;  %s81_s1 = smov [#allocation2]  }
   0x3   :  { %53 = vset.pattern.permute.xlu0 %v80_v1  ;;  %v15_v4 = vld [vmem:[%s117_s0] sm:$0xff]  ;;  %s40_s20 = sshll.u32 %s81_s1, 4  ;;  %s42_s23 = sshll.u32 %s120_s3, 4  ;;  %s41_s20 = int_to_ptr.vmem [resolvable:$true] %s40_s20  ;;  %s43_s23 = int_to_ptr.hbm [resolvable:$true] %s42_s23 }
   0x4   :  { %20 = vperm.xlu0 %53, %v17_v0  }
   0xc   :  { %28 = vperm.xlu0 %53, %v25_v2  }
  0x76   :  { %v21_v3 = vpop.permute.xlu0 %20 }
  0x77   :  { %v23_v6 = vmul.f32 %v21_v3, %v15_v4  ;;  %v24_v7 = vmul.f32 %v21_v3, %v16_v5 }
  0x7e   :  { %v29_v8 = vpop.permute.xlu0 %28 }
  0x7f   :  { %v31_v9 = vadd.f32 %v29_v8, %v23_v6  ;;  %v32_v10 = vadd.f32 %v29_v8, %v24_v7 }
  0x81   :  { %33 = vst [vmem:[#allocation2] sm:$0xff] %v31_v9 }
  0x82   :  { %34 = vst [vmem:[#allocation2 + $0x8] sm:$0xff] %v32_v10 }
  0x83   :  { %45 = dma.vmem_to_hbm [thread:$0]  %s41_s20, 256, %s43_s23, [#allocation3]  }
  0x84   :  { %78 = dma.done.wait [#allocation3], 256  }
  0x85   :  { %79 = vsyncadd [#allocation3], 4294967040 }
  0x86   :  { %50 = vsyncpa [#allocation3], 1 }

</bundles_post_ra>
